<compile_context>
chip_gen: v5e
topology: v5e:2x2
jax: 0.10.0
libtpu: 0.0.40
codegen_flags: <defaults>
</compile_context>

<pallas_src>
import functools

import jax
import jax.numpy as jnp
from jax.experimental import pallas as pl
from jax.experimental.pallas import tpu as pltpu

_LANES = 128
_SUBLANES = 8
_TARGET_TILE_BYTES = 1 << 20  # ~1 MiB x-tile: pipelined, fits every VMEM budget


# ----------------------------- kernels ------------------------------------ #

def _pe_add_kernel(x_ref, pe_ref, o_ref):
    x = x_ref[...]                                   # (1, tile_rows, last)
    o_ref[...] = (x + pe_ref[...].astype(x.dtype)).astype(o_ref.dtype)


def _pe_add_dropout_kernel(x_ref, pe_ref, bits_ref, o_ref, *, threshold, scale):
    x = x_ref[...]                                   # (1, tile_rows, last)
    y = x + pe_ref[...].astype(x.dtype)
    keep = (bits_ref[...] >= jnp.uint32(threshold)).astype(x.dtype)  # P(keep)=1-p
    o_ref[...] = (y * (keep * jnp.asarray(scale, dtype=x.dtype))).astype(o_ref.dtype)


# ----------------------------- helpers ------------------------------------ #

def make_pmat(d_emb, max_seq_len=50):
    """Deterministic positional-encoding table, matching the torch __init__."""
    timesteps = jnp.arange(0, max_seq_len, 1, dtype=jnp.float32)[:, None]     # (L, 1)
    frequencies = 1.0 / (10000.0 ** (jnp.arange(0, d_emb, 2, dtype=jnp.float32) / d_emb))
    pmat = jnp.zeros((max_seq_len, d_emb), dtype=jnp.float32)
    pmat = pmat.at[:, 0::2].set(jnp.sin(frequencies * timesteps))
    pmat = pmat.at[:, 1::2].set(jnp.cos(frequencies * timesteps))
    return pmat[None]                                                          # (1, L, D)


def _choose_layout(S, D, itemsize):
    """Pick a lane-dense (rows, last) view of the (S, D) slab and a row tile."""
    N = S * D
    if N % _LANES == 0:
        rows, last = N // _LANES, _LANES           # lane-dense: full 128-lane stores
    else:
        rows, last = S, D                          # fallback: natural layout
    bytes_per_row = max(1, last * itemsize)
    target_rows = max(_SUBLANES, _TARGET_TILE_BYTES // bytes_per_row)
    if rows <= target_rows:
        tile_rows = rows                           # full dim -> always legal block
    else:
        tile_rows = max(_SUBLANES, (target_rows // _SUBLANES) * _SUBLANES)
    return rows, last, tile_rows


# ----------------------------- wrapper ------------------------------------ #

def positional_encoding(x, pmat, *, dropout_p=0.1, training=True, rng_key=None):
    """x: (B, S, D); pmat: (1, max_seq_len, D) from make_pmat."""
    B, S, D = x.shape
    pe = pmat[:, :S, :]                            # (1, S, D), plain-JAX glue
    itemsize = jnp.dtype(x.dtype).itemsize
    rows, last, tile_rows = _choose_layout(S, D, itemsize)

    x_r = x.reshape(B, rows, last)
    pe_r = pe.reshape(1, rows, last)
    grid_r = pl.cdiv(rows, tile_rows)
    # Row-tiles outer, batch inner: consecutive grid steps share the same pmat
    # block index, so its tile is not re-fetched per batch element.
    grid = (grid_r, B)

    blk = (1, tile_rows, last)
    x_spec = pl.BlockSpec(blk, lambda i, b: (b, i, 0))
    pe_spec = pl.BlockSpec(blk, lambda i, b: (0, i, 0))
    out_spec = pl.BlockSpec(blk, lambda i, b: (b, i, 0))
    out_shape = jax.ShapeDtypeStruct((B, rows, last), x.dtype)

    use_dropout = bool(training) and float(dropout_p) > 0.0
    if use_dropout:
        assert 0.0 < dropout_p < 1.0, "dropout_p must be in [0, 1) when training"
        if rng_key is None:
            rng_key = jax.random.PRNGKey(0)
        bits = jax.random.bits(rng_key, (B, rows, last), dtype=jnp.uint32)
        threshold = min(int(float(dropout_p) * 4294967296.0), 4294967295)
        scale = 1.0 / (1.0 - float(dropout_p))
        kernel = functools.partial(_pe_add_dropout_kernel,
                                   threshold=threshold, scale=scale)
        in_specs = [x_spec, pe_spec, pl.BlockSpec(blk, lambda i, b: (b, i, 0))]
        operands = (x_r, pe_r, bits)
        bytes_accessed = 2 * x_r.size * itemsize + pe_r.size * 4 + bits.size * 4
        flops = 3 * x_r.size
    else:
        kernel = _pe_add_kernel
        in_specs = [x_spec, pe_spec]
        operands = (x_r, pe_r)
        bytes_accessed = 2 * x_r.size * itemsize + pe_r.size * 4
        flops = x_r.size

    out = pl.pallas_call(
        kernel,
        out_shape=out_shape,
        grid=grid,
        in_specs=in_specs,
        out_specs=out_spec,
        compiler_params=pltpu.CompilerParams(
            dimension_semantics=("parallel", "parallel")),
        cost_estimate=pl.CostEstimate(
            flops=flops, transcendentals=0, bytes_accessed=bytes_accessed),
    )(*operands)

    return out.reshape(B, S, D)


# ------------------------------- main -------------------------------------- #

if __name__ == "__main__":
    B, S, D = 2, 8, 32
    max_seq_len = 50
    dropout_p = 0.1

    key = jax.random.PRNGKey(0)
    kx, kd = jax.random.split(key)
    x = jax.random.normal(kx, (B, S, D), dtype=jnp.float32)
    pmat = make_pmat(D, max_seq_len)

    # Training-mode forward (dropout active, deterministic mask from kd).
    out = positional_encoding(x, pmat, dropout_p=dropout_p, training=True, rng_key=kd)
    out = jax.block_until_ready(out)
    assert out.shape == (B, S, D)

    # Eval-mode forward must equal the pure-JAX reference exactly.
    out_eval = positional_encoding(x, pmat, dropout_p=dropout_p, training=False)
    out_eval = jax.block_until_ready(out_eval)
    ref = x + pmat[:, :S, :]
    assert jnp.allclose(out_eval, ref, atol=1e-6), "eval-mode mismatch"

    # Training-mode sanity: every kept (nonzero) element equals (x+pe)/(1-p).
    ref_scaled = ref / (1.0 - dropout_p)
    kept = jnp.abs(out) > 0
    assert jnp.allclose(jnp.where(kept, out - ref_scaled, 0.0), 0.0, atol=1e-5), \
        "training-mode kept elements mismatch"

    print("KERNEL_OK")
</pallas_src>

<mosaic_0001>
module attributes {stable_mosaic.version = 11 : i64} {
  func.func @_pe_add_dropout_kernel(%arg0: i32, %arg1: i32, %arg2: memref<1x2x128xf32, #tpu.memory_space<vmem>>, %arg3: memref<1x2x128xf32, #tpu.memory_space<vmem>>, %arg4: memref<1x2x128xi32, #tpu.memory_space<vmem>>, %arg5: memref<1x2x128xf32, #tpu.memory_space<vmem>>) attributes {dimension_semantics = [#tpu.dimension_semantics<parallel>, #tpu.dimension_semantics<parallel>], iteration_bounds = array<i64: 1, 2>, scalar_prefetch = 0 : i64, scratch_operands = 0 : i64, tpu.core_type = #tpu.core_type<tc>, window_params = [{transform_indices = @transform_0, window_bounds = array<i64: 1, 2, 128>}, {transform_indices = @transform_1, window_bounds = array<i64: 1, 2, 128>}, {transform_indices = @transform_2, window_bounds = array<i64: 1, 2, 128>}, {transform_indices = @transform_3, window_bounds = array<i64: 1, 2, 128>}]} {
    %c0 = arith.constant 0 : index
    %c0_0 = arith.constant 0 : index
    %c0_1 = arith.constant 0 : index
    %0 = vector.load %arg2[%c0, %c0_0, %c0_1] : memref<1x2x128xf32, #tpu.memory_space<vmem>>, vector<1x2x128xf32>
    %c0_2 = arith.constant 0 : index
    %c0_3 = arith.constant 0 : index
    %c0_4 = arith.constant 0 : index
    %1 = vector.load %arg3[%c0_2, %c0_3, %c0_4] : memref<1x2x128xf32, #tpu.memory_space<vmem>>, vector<1x2x128xf32>
    %2 = arith.addf %0, %1 : vector<1x2x128xf32>
    %c0_5 = arith.constant 0 : index
    %c0_6 = arith.constant 0 : index
    %c0_7 = arith.constant 0 : index
    %3 = vector.load %arg4[%c0_5, %c0_6, %c0_7] : memref<1x2x128xi32, #tpu.memory_space<vmem>>, vector<1x2x128xi32>
    %c429496729_i32 = arith.constant 429496729 : i32
    %4 = vector.broadcast %c429496729_i32 : i32 to vector<1x2x128xi32>
    %5 = arith.cmpi uge, %3, %4 : vector<1x2x128xi32>
    %6 = arith.extui %5 : vector<1x2x128xi1> to vector<1x2x128xi32>
    %7 = arith.sitofp %6 : vector<1x2x128xi32> to vector<1x2x128xf32>
    %cst = arith.constant 1.11111116 : f32
    %8 = vector.broadcast %cst : f32 to vector<1x2x128xf32>
    %9 = arith.mulf %7, %8 : vector<1x2x128xf32>
    %10 = arith.mulf %2, %9 : vector<1x2x128xf32>
    %c0_8 = arith.constant 0 : index
    %c0_9 = arith.constant 0 : index
    %c0_10 = arith.constant 0 : index
    %11 = vector.load %arg5[%c0_8, %c0_9, %c0_10] : memref<1x2x128xf32, #tpu.memory_space<vmem>>, vector<1x2x128xf32>
    tpu.vector_store %arg5[%c0_8, %c0_9, %c0_10], %10 {strides = array<i32>} : memref<1x2x128xf32, #tpu.memory_space<vmem>>, vector<1x2x128xf32>,
    return
  }
  func.func @transform_0(%arg0: i32, %arg1: i32) -> (i32, i32, i32) {
    %c0_i32 = arith.constant 0 : i32
    %c0_i32_0 = arith.constant 0 : i32
    return %arg1, %arg0, %c0_i32 : i32, i32, i32
  }
  func.func @transform_1(%arg0: i32, %arg1: i32) -> (i32, i32, i32) {
    %c0_i32 = arith.constant 0 : i32
    %c0_i32_0 = arith.constant 0 : i32
    %c0_i32_1 = arith.constant 0 : i32
    return %c0_i32, %arg0, %c0_i32_0 : i32, i32, i32
  }
  func.func @transform_2(%arg0: i32, %arg1: i32) -> (i32, i32, i32) {
    %c0_i32 = arith.constant 0 : i32
    %c0_i32_0 = arith.constant 0 : i32
    return %arg1, %arg0, %c0_i32 : i32, i32, i32
  }
  func.func @transform_3(%arg0: i32, %arg1: i32) -> (i32, i32, i32) {
    %c0_i32 = arith.constant 0 : i32
    %c0_i32_0 = arith.constant 0 : i32
    return %arg1, %arg0, %c0_i32 : i32, i32, i32
  }
}

</mosaic_0001>

<bundles_post_ra>
// kernel: tpu_custom_call.1
= control target key start
LH: loop header
LB: loop body
LE: loop exit
PB: predicated region body
PF: predicated region fallthrough
CT: control target
= control target key end

     0   :  { %8 = vsyncpa [#allocation3], 0  ;;  %s878_s0 = inlined_call_operand.hbm [shape: f32[2,2,128], index: 0, kind: input, shape index: {}]   ;;  %s879_s1 = inlined_call_operand.hbm [shape: f32[1,2,128], index: 1, kind: input, shape index: {}]   ;;  %s880_s2 = inlined_call_operand.hbm [shape: u32[2,2,128], index: 2, kind: input, shape index: {}]   ;;  %s881_s3 = inlined_call_operand.hbm [shape: f32[2,2,128], index: 3, kind: output, shape index: {}]  }
   0x1   :  { %10 = vsyncpa [#allocation3 + $0x1], 0 }
   0x2   :  { %11 = vsyncpa [#allocation6], 0 }
   0x3   :  { %12 = vsyncpa [#allocation4], 0 }
   0x4   :  { %14 = vsyncpa [#allocation4 + $0x1], 0  ;;  %s711_s12 = smov 0   ;;  %s713_s13 = smov 0  }
   0x5   :  { %s715_s14 = smov 0   ;;  %s717_s15 = smov 0  }
   0x6   :  { %s719_s16 = smov 0   ;;  %s721_s17 = smov 0  }
   0x7 LB: > { %s29_s18 = sadd.s32 1, %s683_s16  ;;  %s41_s19 = sadd.s32 1, %s675_s14  ;;  %s687_s17 = sphi %s721_s17, %s20_s17   ;;  %s683_s16 = sphi %s719_s16, %s892_s16   ;;  %s679_s15 = sphi %s717_s15, %s891_s15   ;;  %s675_s14 = sphi %s715_s14, %s890_s14   ;;  %s671_s13 = sphi %s713_s13, %s889_s13   ;;  %s667_s12 = sphi %s711_s12, %s888_s12  }
   0x8   : > { %p30_p0 = scmp.ge.s32.totalorder %s29_s18, 2  ;;  %p48_p1 = scmp.ne.s32.totalorder %s675_s14, %s671_s13 }
   0x9   : > { %p49_p2 = scmp.eq.s32.totalorder %s687_s17, 0  ;;  %p412_p3 = scmp.ge.s32.totalorder %s687_s17, 2 }
   0xa   : > { %s894_s18 = smov (%p30_p0, %s29_s18), 0  ;;  %p454_p5 = scmp.lt.s32.totalorder %s687_s17, 2 }
   0xb   : > { %p752_p4 = por %p49_p2, %p48_p1  ;;  %s36_s21 = ssub.s32 %s683_s16, %s894_s18 }
   0xc   : > { %s174_s22 = sand.u32 1, %s687_s17   ;;  %p39_p6 = scmp.eq.s32.totalorder %s36_s21, 0 }
   0xd   : > { %s176_s23 = sand.u32 1, %s675_s14   ;;  %s414_s24 = sshll.u32 %s683_s16, 1 }
   0xe   : > { %s763_s25 = scalar_select %p39_p6, %s675_s14, %s41_s19  }
   0xf   : > { %s765_s26 = sshll.u32 %s176_s23, 1  ;;  %s183_s29 = scalar_lea.hbm %s878_s0, %s414_s24 }
  0x10   : > { %s185_s30 = sshll.u32 %s183_s29, 4  ;;  %s178_s4 = scalar_lea.vmem [#allocation2], %s765_s26  ;;  %s186_s30 = int_to_ptr.hbm [resolvable:$true] %s185_s30 }
  0x11   : > { %s187_s5 = sshll.u32 %s178_s4, 4  ;;  %p775_p7 = pnand %p454_p5, %p752_p4  ;;  %s188_s5 = int_to_ptr.vmem [resolvable:$true] %s187_s5 }
  0x12   : > { %s203_s9 = scalar_lea.hbm %s880_s2, %s414_s24  ;;  %s175_s10 = scalar_lea.sflag [#allocation3], %s174_s22 }
  0x13   : > { %445 = dma.hbm_to_vmem [thread:$0]  (!%p775_p7), %s186_s30, 32, %s188_s5, %s175_s10  }
  0x14   : > { %s785_s11 = sadd.s32 4294967295, %s687_s17   ;;  %s409_s19 = sadd.s32 4294967294, %s687_s17  }
  0x15   : > { %p54_p8 = scmp.ne.s32.totalorder %s671_s13, %s667_s12  ;;  %p55_p9 = scmp.eq.s32.totalorder %s785_s11, 0 }
  0x16   : > { %p134_p10 = scmp.eq.s32.totalorder %s785_s11, 1  ;;  %p140_p11 = scmp.eq.s32.totalorder %s409_s19, 1 }
  0x17   : > { %p410_p12 = scmp.ge.s32.totalorder %s687_s17, 1  ;;  %p795_p13 = por %p55_p9, %p54_p8 }
  0x18   : > { %p802_p0 = por %p134_p10, %p48_p1  ;;  %p806_p2 = por %p140_p11, %p54_p8 }
  0x19   : > { %p147_p4 = scmp.lt.s32.totalorder %s687_s17, 3  ;;  %s161_s28 = sshll.u32 %s879_s1, 4  ;;  %s162_s28 = int_to_ptr.hbm [resolvable:$true] %s161_s28 }
  0x1a   : > { %s205_s29 = sshll.u32 %s203_s9, 4  ;;  %s689_s30 = smov [#allocation5]   ;;  %s206_s29 = int_to_ptr.hbm [resolvable:$true] %s205_s29 }
  0x1b   : > { %p811_p5 = pnand %p410_p12, %p147_p4  ;;  %s163_s4 = sshll.u32 %s689_s30, 4  ;;  %s164_s4 = int_to_ptr.vmem [resolvable:$true] %s163_s4 }
  0x1c   : > { %s198_s5 = scalar_lea.vmem [#allocation7], %s765_s26  ;;  %s218_s8 = sand.u32 (!%p811_p5), 1, %s785_s11  }
  0x1d   : > { %p438_p1 = pneg %p811_p5  ;;  %s207_s7 = sshll.u32 %s198_s5, 4  ;;  %s208_s7 = int_to_ptr.vmem [resolvable:$true] %s207_s7 }
  0x1e   : > { %448 = dma.hbm_to_vmem [thread:$0]  (!%p775_p7), %s206_s29, 32, %s208_s7, %s175_s10  }
  0x1f   : > { %p439_p6 = pnand %p438_p1, %p55_p9  ;;  %216 = sbr.rel (%p811_p5) target bundleno = 56 (0x38), region = 32 }
  0x20   : > { %s220_s9 = sand.u32 (!%p811_p5), 1, %s671_s13   ;;  %s219_s24 = scalar_lea.sflag (!%p811_p5), [#allocation3], %s218_s8 }
  0x21   : > { %441 = dma.hbm_to_vmem [thread:$0]  (!%p439_p6), %s162_s28, 32, %s164_s4, [#allocation6]  }
  0x22   : > { %s418_s19 = sshll.u32 (!%p811_p5), %s220_s9, 1 }
  0x23   : > { %s222_s27 = scalar_lea.vmem (!%p811_p5), [#allocation2], %s418_s19 }
  0x24   : > { %650 = dma.done.wait (%p795_p13), %s219_s24, 32  }
  0x25   : > { %652 = vsyncadd (%p795_p13), %s219_s24, 4294967264 }
  0x26   : > { %654 = dma.done.wait (%p55_p9), [#allocation6], 32  }
  0x27   : > { %656 = vsyncadd (%p55_p9), [#allocation6], 4294967264  ;;  %s237_s26 = scalar_lea.vmem [#allocation7], %s418_s19 }
  0x28   : > { %658 = dma.done.wait (%p795_p13), %s219_s24, 32  }
  0x29   : > { %660 = vsyncadd (%p795_p13), %s219_s24, 4294967264  ;;  %s425_s6 = sshll.u32 %s679_s15, 1  ;;  %v266_v0 = vld [vmem:[%s222_s27] sm:$0x3]  ;;  %v267_v1 = vld [vmem:[#allocation5] sm:$0x3] }
  0x2a   : > { %v269_v2 = vld [vmem:[%s237_s26] sm:$0x3]  ;;  %s290_s28 = scalar_lea.hbm %s881_s3, %s425_s6  ;;  %v268_v4 = vadd.f32 %v267_v1, %v266_v0  ;;  %v690_v5 = vmov 0.0   ;;  %s265_s11 = scalar_lea.vmem [#allocation8], %s418_s19 }
  0x2b   : > { %v422_v3 = vxor.u32 2147483648, %v269_v2  ;;  %s292_s29 = sshll.u32 %s265_s11, 4  ;;  %s294_s30 = sshll.u32 %s290_s28, 4  ;;  %s293_s29 = int_to_ptr.vmem [resolvable:$true] %s292_s29  ;;  %s295_s30 = int_to_ptr.hbm [resolvable:$true] %s294_s30 }
  0x2c   : > { %s279_s15 = scalar_lea.sflag [#allocation4], %s220_s9  ;;  %s611_s20 = sshra.s32 %s295_s30, 4  ;;  %s612_s20 = int_to_ptr.hbm [resolvable:$true] %s611_s20 }
  0x2d   : > { %vm272_vm0 = vcmp.ge.s32.totalorder %v422_v3, 2576980377  ;;  %s613_s4 = scalar_lea.hbm %s612_s20, 2  ;;  %s617_s8 = scalar_lea.hbm %s881_s3, 4 }
  0x2e   : > { %v423_v6 = vsel %vm272_vm0, 1.0, %v690_v5  ;;  %p614_p7 = scmp.ne.s32.totalorder %s612_s20, %s613_s4  ;;  %p618_p10 = scmp.lt.s32.totalorder %s612_s20, %s881_s3 }
  0x2f   : > { %v275_v7 = vmul.f32 1.1111112, %v423_v6  ;;  %p619_p11 = scmp.lt.s32.totalorder %s617_s8, %s613_s4 }
  0x30   : > { %p615_p8 = pnand %p614_p7, %p802_p0 }
  0x31   : > { %v276_v8 = vmul.f32 %v275_v7, %v268_v4  ;;  %p620_p12 = por %p619_p11, %p618_p10 }
  0x32   : > { %p616_p9 = pneg %p615_p8 }
  0x33   : > { %277 = vst [vmem:[%s265_s11] sm:$0x3] %v276_v8 }
  0x34   : > { %p621_p13 = pnand %p620_p12, %p616_p9 }
  0x36   : > { %624 = shalt.err (!%p621_p13)
}
  0x37   : > { %436 = dma.vmem_to_hbm [thread:$0]  (%p802_p0), %s293_s29, 32, %s295_s30, %s279_s15  }
  0x38 PF: > { %s306_s9 = sand.u32 1, %s667_s12   ;;  %p450_p4 = pnand %p412_p3, %p806_p2 }
  0x39   : > { %s307_s27 = scalar_lea.sflag [#allocation4], %s306_s9 }
  0x3a   : > { %p451_p5 = pneg %p450_p4 }
  0x3c   : > { %662 = dma.done.wait (%p451_p5), %s307_s27, 32  }
  0x3d   : > { %664 = vsyncadd (%p451_p5), %s307_s27, 4294967264  ;;  %s20_s17 = sadd.s32 1, %s687_s17   ;;  %s888_s12 = smov %s671_s13 }
  0x3e   : > { %p17_p1 = scmp.ge.s32.totalorder %s20_s17, 4   ;;  %s889_s13 = smov %s675_s14 }
  0x3f   : > { %s890_s14 = smov %s763_s25  ;;  %s891_s15 = smov %s683_s16 }
  0x40   : > { %s892_s16 = smov %s894_s18  ;;  %19 = sbr.rel (!%p17_p1) target bundleno = 7 (0x7), region = 93 }
  0x45   :  { %313 = vsyncpa [#allocation3], 1 }
  0x46   :  { %315 = vsyncpa [#allocation3 + $0x1], 1 }
  0x47   :  { %316 = vsyncpa [#allocation6], 1 }
  0x48   :  { %317 = vsyncpa [#allocation4], 1 }
  0x49   :  { %319 = vsyncpa [#allocation4 + $0x1], 1 }

</bundles_post_ra>
